<compile_context>
chip_gen: v7x
topology: tpu7x:2x2x1
jax: 0.10.0
libtpu: 0.0.40
codegen_flags: <defaults>
</compile_context>

<pallas_src>
import numpy as np
import jax
import jax.numpy as jnp
from jax.experimental import pallas as pl
from jax.experimental.pallas import tpu as pltpu


def make_seasonality_basis(theta_dim: int, horizon: int) -> jnp.ndarray:
    """S matrix of seasonality_model: [theta_dim, horizon], float32."""
    t = np.arange(0, horizon) / horizon
    p = theta_dim
    p1, p2 = (p // 2, p // 2) if p % 2 == 0 else (p // 2, p // 2 + 1)
    s1 = np.array([np.cos(2 * np.pi * i * t) for i in range(p1)])
    s2 = np.array([np.sin(2 * np.pi * i * t) for i in range(p2)])
    S = np.concatenate([s1, s2], axis=0).astype(np.float32)
    return jnp.asarray(S)


def _seasonality_kernel(x_ref, w1b_ref, w234_ref, wsqb_ref, weff_ref, out_ref):
    # x_ref: [Cin, B*N*T] — channels on sublanes, (batch, node, time) pixels
    # lane-dense on the last axis.
    cin = x_ref.shape[0]
    hdim = w1b_ref.shape[0]
    t_len = weff_ref.shape[0]

    x = x_ref[...]                                        # [Cin, B*N*T]
    w1b = w1b_ref[...]                                    # [H, Cin+4] = w1 | b1 b2 b3 b4
    w1 = w1b[:, :cin]
    b1 = w1b[:, cin:cin + 1]
    b2 = w1b[:, cin + 1:cin + 2]
    b3 = w1b[:, cin + 2:cin + 3]
    b4 = w1b[:, cin + 3:cin + 4]

    # 1x1-conv stack as left matmuls: [H, C] @ [C, B*N*T] -> [H, B*N*T]
    h = jnp.maximum(jnp.dot(w1, x, preferred_element_type=jnp.float32) + b1, 0.0)
    h = jnp.maximum(jnp.dot(w234_ref[0], h, preferred_element_type=jnp.float32) + b2, 0.0)
    h = jnp.maximum(jnp.dot(w234_ref[1], h, preferred_element_type=jnp.float32) + b3, 0.0)
    h = jnp.maximum(jnp.dot(w234_ref[2], h, preferred_element_type=jnp.float32) + b4, 0.0)

    # feature_squeeze, bias packed as the last column of wsqb: [Cout, B*N*T]
    wsqb = wsqb_ref[...]                                  # [Cout, H+1]
    sq = (jnp.dot(wsqb[:, :hdim], h, preferred_element_type=jnp.float32)
          + wsqb[:, hdim:hdim + 1])

    # Relayout [Cout, (b,n,t)] -> [(b*N+n)*Cout + c, t] with static lane
    # slices + a sublane concat (robust Mosaic lowering; avoids a
    # lane->sublane reshape and the old mostly-zero block-diagonal matmul).
    n_pix = sq.shape[1] // t_len                          # B*N
    sq_r = jnp.concatenate(
        [sq[:, i * t_len:(i + 1) * t_len] for i in range(n_pix)], axis=0)

    # Fused (bias-free) theta conv + seasonality basis, back & fore
    # concatenated along the lane axis:
    #   out[(b,n)*Cout + c, l] = sum_t sq[c, (b,n,t)] * w_eff[t, l]
    out_ref[...] = jnp.dot(sq_r, weff_ref[...], preferred_element_type=jnp.float32)


def seasonality_block_pallas(x_nchw, params, S_back, S_fore):
    """x_nchw: [B, Cin, N, T] float32. Returns (backcast, forecast) [B,Cout,N,L*]."""
    B, Cin, N, T = x_nchw.shape
    H = params["w1"].shape[1]
    Cout = params["wsq"].shape[1]
    Lb = S_back.shape[1]
    Lf = S_fore.shape[1]
    L = Lb + Lf

    # Channels-on-sublane / (batch, node, time)-on-lane; tiny XLA transpose.
    x = jnp.transpose(x_nchw, (1, 0, 2, 3)).reshape(Cin, B * N * T)

    # Coalesced weight slabs in left-multiply layout (5 input streams total).
    w1b = jnp.concatenate(
        [params["w1"].T, params["b1"].T, params["b2"].T,
         params["b3"].T, params["b4"].T], axis=1)                   # [H, Cin+4]
    w234 = jnp.stack(
        [params["w2"].T, params["w3"].T, params["w4"].T], axis=0)   # [3, H, H]
    wsqb = jnp.concatenate([params["wsq"].T, params["bsq"].T], axis=1)  # [Cout, H+1]

    # Exact fusion of the bias-free theta convs with the seasonality bases,
    # back & fore concatenated along lanes: [T, Lb+Lf].
    w_eff = jnp.concatenate(
        [jnp.dot(params["wtb"].T, S_back), jnp.dot(params["wtf"].T, S_fore)],
        axis=1)

    vmem = pl.BlockSpec(memory_space=pltpu.MemorySpace.VMEM)
    out_flat = pl.pallas_call(
        _seasonality_kernel,
        out_shape=jax.ShapeDtypeStruct((B * N * Cout, L), jnp.float32),
        in_specs=[vmem, vmem, vmem, vmem, vmem],
        out_specs=vmem,
    )(x, w1b, w234, wsqb, w_eff)

    # Rows are ordered ((b*N + n)*Cout + c); split back/fore in the wrapper.
    out = out_flat.reshape(B, N, Cout, L)
    out = jnp.transpose(out, (0, 2, 1, 3))                 # [B, Cout, N, Lb+Lf]
    return out[..., :Lb], out[..., Lb:]


def seasonality_block_ref(x_nchw, params, S_back, S_fore):
    """Pure-JAX reference mirroring the PyTorch forward."""
    x = jnp.transpose(x_nchw, (0, 2, 3, 1))  # [B, N, T, Cin]
    h = jax.nn.relu(jnp.einsum("bntc,ch->bnth", x, params["w1"]) + params["b1"])
    h = jax.nn.relu(jnp.einsum("bnth,hk->bntk", h, params["w2"]) + params["b2"])
    h = jax.nn.relu(jnp.einsum("bnth,hk->bntk", h, params["w3"]) + params["b3"])
    h = jax.nn.relu(jnp.einsum("bnth,hk->bntk", h, params["w4"]) + params["b4"])
    sq = jnp.einsum("bnth,ho->bnto", h, params["wsq"]) + params["bsq"]  # [B,N,T,Cout]
    theta_b = jnp.einsum("bntc,pt->bcnp", sq, params["wtb"])
    theta_f = jnp.einsum("bntc,pt->bcnp", sq, params["wtf"])
    back = jnp.einsum("bcnp,py->bcny", theta_b, S_back)
    fore = jnp.einsum("bcnp,py->bcny", theta_f, S_fore)
    return back, fore


def init_params(key, Cin, H, Cout, theta_dim, backcast_length):
    ks = jax.random.split(key, 12)
    s = 0.1

    def w(k, shape):
        return (s * jax.random.normal(k, shape)).astype(jnp.float32)

    return {
        # 1x1 conv weights stored transposed: [in, out]; biases as [1, out]
        "w1": w(ks[0], (Cin, H)),  "b1": w(ks[1], (1, H)),
        "w2": w(ks[2], (H, H)),    "b2": w(ks[3], (1, H)),
        "w3": w(ks[4], (H, H)),    "b3": w(ks[5], (1, H)),
        "w4": w(ks[6], (H, H)),    "b4": w(ks[7], (1, H)),
        "wsq": w(ks[8], (H, Cout)), "bsq": w(ks[9], (1, Cout)),
        # theta convs (no bias) stored as conv-layout [theta_dim, backcast_length]
        "wtb": w(ks[10], (theta_dim, backcast_length)),
        "wtf": w(ks[11], (theta_dim, backcast_length)),
    }


if __name__ == "__main__":
    B = 2
    Cin = 4
    H = 32
    Cout = 8
    N = 16                 # num_nodes
    backcast_length = 16   # == time_steps of the input
    forecast_length = 8
    theta_dim = 8

    key = jax.random.PRNGKey(0)
    kx, kp = jax.random.split(key)
    x = jax.random.normal(kx, (B, Cin, N, backcast_length), dtype=jnp.float32)
    params = init_params(kp, Cin, H, Cout, theta_dim, backcast_length)

    S_back = make_seasonality_basis(theta_dim, backcast_length)   # [P, Lb]
    S_fore = make_seasonality_basis(theta_dim, forecast_length)   # [P, Lf]

    back, fore = seasonality_block_pallas(x, params, S_back, S_fore)
    back = jax.block_until_ready(back)
    fore = jax.block_until_ready(fore)

    back_ref, fore_ref = seasonality_block_ref(x, params, S_back, S_fore)
    np.testing.assert_allclose(np.asarray(back), np.asarray(back_ref),
                               rtol=1e-3, atol=1e-3)
    np.testing.assert_allclose(np.asarray(fore), np.asarray(fore_ref),
                               rtol=1e-3, atol=1e-3)

    print("KERNEL_OK")
</pallas_src>

<mosaic_0001>
module attributes {stable_mosaic.version = 11 : i64} {
  func.func @_seasonality_kernel(%arg0: memref<4x512xf32, #tpu.memory_space<vmem>>, %arg1: memref<32x8xf32, #tpu.memory_space<vmem>>, %arg2: memref<3x32x32xf32, #tpu.memory_space<vmem>>, %arg3: memref<8x33xf32, #tpu.memory_space<vmem>>, %arg4: memref<16x24xf32, #tpu.memory_space<vmem>>, %arg5: memref<256x24xf32, #tpu.memory_space<vmem>>) attributes {dimension_semantics = [], scalar_prefetch = 0 : i64, scratch_operands = 0 : i64, tpu.core_type = #tpu.core_type<tc>} {
    %c0 = arith.constant 0 : index
    %c0_0 = arith.constant 0 : index
    %0 = vector.load %arg0[%c0, %c0_0] : memref<4x512xf32, #tpu.memory_space<vmem>>, vector<4x512xf32>
    %c0_1 = arith.constant 0 : index
    %c0_2 = arith.constant 0 : index
    %1 = vector.load %arg1[%c0_1, %c0_2] : memref<32x8xf32, #tpu.memory_space<vmem>>, vector<32x8xf32>
    %2 = vector.extract_strided_slice %1 {offsets = [0, 0], sizes = [32, 4], strides = [1, 1]} : vector<32x8xf32> to vector<32x4xf32>
    %3 = vector.extract_strided_slice %1 {offsets = [0, 4], sizes = [32, 1], strides = [1, 1]} : vector<32x8xf32> to vector<32x1xf32>
    %4 = vector.extract_strided_slice %1 {offsets = [0, 5], sizes = [32, 1], strides = [1, 1]} : vector<32x8xf32> to vector<32x1xf32>
    %5 = vector.extract_strided_slice %1 {offsets = [0, 6], sizes = [32, 1], strides = [1, 1]} : vector<32x8xf32> to vector<32x1xf32>
    %6 = vector.extract_strided_slice %1 {offsets = [0, 7], sizes = [32, 1], strides = [1, 1]} : vector<32x8xf32> to vector<32x1xf32>
    %cst = arith.constant dense<0.000000e+00> : vector<32x512xf32>
    %7 = tpu.matmul %2, %0, %cst {dimension_numbers = #tpu.dot_dimension_numbers<[1], [0], [0], [1], [0, 0, 1, 1], [], []>} : vector<32x4xf32>, vector<4x512xf32>, vector<32x512xf32> -> vector<32x512xf32>
    %8 = vector.broadcast %3 : vector<32x1xf32> to vector<32x512xf32>
    %9 = arith.addf %7, %8 : vector<32x512xf32>
    %cst_3 = arith.constant 0.000000e+00 : f32
    %10 = vector.broadcast %cst_3 : f32 to vector<32x512xf32>
    %11 = arith.maximumf %9, %10 : vector<32x512xf32>
    %c0_4 = arith.constant 0 : index
    %c0_5 = arith.constant 0 : index
    %c0_6 = arith.constant 0 : index
    %12 = vector.load %arg2[%c0_4, %c0_5, %c0_6] : memref<3x32x32xf32, #tpu.memory_space<vmem>>, vector<1x32x32xf32>
    %13 = vector.shape_cast %12 : vector<1x32x32xf32> to vector<32x32xf32>
    %cst_7 = arith.constant dense<0.000000e+00> : vector<32x512xf32>
    %14 = tpu.matmul %13, %11, %cst_7 {dimension_numbers = #tpu.dot_dimension_numbers<[1], [0], [0], [1], [0, 0, 1, 1], [], []>} : vector<32x32xf32>, vector<32x512xf32>, vector<32x512xf32> -> vector<32x512xf32>
    %15 = vector.broadcast %4 : vector<32x1xf32> to vector<32x512xf32>
    %16 = arith.addf %14, %15 : vector<32x512xf32>
    %cst_8 = arith.constant 0.000000e+00 : f32
    %17 = vector.broadcast %cst_8 : f32 to vector<32x512xf32>
    %18 = arith.maximumf %16, %17 : vector<32x512xf32>
    %c1 = arith.constant 1 : index
    %c0_9 = arith.constant 0 : index
    %c0_10 = arith.constant 0 : index
    %19 = vector.load %arg2[%c1, %c0_9, %c0_10] : memref<3x32x32xf32, #tpu.memory_space<vmem>>, vector<1x32x32xf32>
    %20 = vector.shape_cast %19 : vector<1x32x32xf32> to vector<32x32xf32>
    %cst_11 = arith.constant dense<0.000000e+00> : vector<32x512xf32>
    %21 = tpu.matmul %20, %18, %cst_11 {dimension_numbers = #tpu.dot_dimension_numbers<[1], [0], [0], [1], [0, 0, 1, 1], [], []>} : vector<32x32xf32>, vector<32x512xf32>, vector<32x512xf32> -> vector<32x512xf32>
    %22 = vector.broadcast %5 : vector<32x1xf32> to vector<32x512xf32>
    %23 = arith.addf %21, %22 : vector<32x512xf32>
    %cst_12 = arith.constant 0.000000e+00 : f32
    %24 = vector.broadcast %cst_12 : f32 to vector<32x512xf32>
    %25 = arith.maximumf %23, %24 : vector<32x512xf32>
    %c2 = arith.constant 2 : index
    %c0_13 = arith.constant 0 : index
    %c0_14 = arith.constant 0 : index
    %26 = vector.load %arg2[%c2, %c0_13, %c0_14] : memref<3x32x32xf32, #tpu.memory_space<vmem>>, vector<1x32x32xf32>
    %27 = vector.shape_cast %26 : vector<1x32x32xf32> to vector<32x32xf32>
    %cst_15 = arith.constant dense<0.000000e+00> : vector<32x512xf32>
    %28 = tpu.matmul %27, %25, %cst_15 {dimension_numbers = #tpu.dot_dimension_numbers<[1], [0], [0], [1], [0, 0, 1, 1], [], []>} : vector<32x32xf32>, vector<32x512xf32>, vector<32x512xf32> -> vector<32x512xf32>
    %29 = vector.broadcast %6 : vector<32x1xf32> to vector<32x512xf32>
    %30 = arith.addf %28, %29 : vector<32x512xf32>
    %cst_16 = arith.constant 0.000000e+00 : f32
    %31 = vector.broadcast %cst_16 : f32 to vector<32x512xf32>
    %32 = arith.maximumf %30, %31 : vector<32x512xf32>
    %c0_17 = arith.constant 0 : index
    %c0_18 = arith.constant 0 : index
    %33 = vector.load %arg3[%c0_17, %c0_18] : memref<8x33xf32, #tpu.memory_space<vmem>>, vector<8x33xf32>
    %34 = vector.extract_strided_slice %33 {offsets = [0, 0], sizes = [8, 32], strides = [1, 1]} : vector<8x33xf32> to vector<8x32xf32>
    %cst_19 = arith.constant dense<0.000000e+00> : vector<8x512xf32>
    %35 = tpu.matmul %34, %32, %cst_19 {dimension_numbers = #tpu.dot_dimension_numbers<[1], [0], [0], [1], [0, 0, 1, 1], [], []>} : vector<8x32xf32>, vector<32x512xf32>, vector<8x512xf32> -> vector<8x512xf32>
    %36 = vector.extract_strided_slice %33 {offsets = [0, 32], sizes = [8, 1], strides = [1, 1]} : vector<8x33xf32> to vector<8x1xf32>
    %37 = vector.broadcast %36 : vector<8x1xf32> to vector<8x512xf32>
    %38 = arith.addf %35, %37 : vector<8x512xf32>
    %39 = vector.extract_strided_slice %38 {offsets = [0, 0], sizes = [8, 16], strides = [1, 1]} : vector<8x512xf32> to vector<8x16xf32>
    %40 = vector.extract_strided_slice %38 {offsets = [0, 16], sizes = [8, 16], strides = [1, 1]} : vector<8x512xf32> to vector<8x16xf32>
    %41 = vector.extract_strided_slice %38 {offsets = [0, 32], sizes = [8, 16], strides = [1, 1]} : vector<8x512xf32> to vector<8x16xf32>
    %42 = vector.extract_strided_slice %38 {offsets = [0, 48], sizes = [8, 16], strides = [1, 1]} : vector<8x512xf32> to vector<8x16xf32>
    %43 = vector.extract_strided_slice %38 {offsets = [0, 64], sizes = [8, 16], strides = [1, 1]} : vector<8x512xf32> to vector<8x16xf32>
    %44 = vector.extract_strided_slice %38 {offsets = [0, 80], sizes = [8, 16], strides = [1, 1]} : vector<8x512xf32> to vector<8x16xf32>
    %45 = vector.extract_strided_slice %38 {offsets = [0, 96], sizes = [8, 16], strides = [1, 1]} : vector<8x512xf32> to vector<8x16xf32>
    %46 = vector.extract_strided_slice %38 {offsets = [0, 112], sizes = [8, 16], strides = [1, 1]} : vector<8x512xf32> to vector<8x16xf32>
    %47 = vector.extract_strided_slice %38 {offsets = [0, 128], sizes = [8, 16], strides = [1, 1]} : vector<8x512xf32> to vector<8x16xf32>
    %48 = vector.extract_strided_slice %38 {offsets = [0, 144], sizes = [8, 16], strides = [1, 1]} : vector<8x512xf32> to vector<8x16xf32>
    %49 = vector.extract_strided_slice %38 {offsets = [0, 160], sizes = [8, 16], strides = [1, 1]} : vector<8x512xf32> to vector<8x16xf32>
    %50 = vector.extract_strided_slice %38 {offsets = [0, 176], sizes = [8, 16], strides = [1, 1]} : vector<8x512xf32> to vector<8x16xf32>
    %51 = vector.extract_strided_slice %38 {offsets = [0, 192], sizes = [8, 16], strides = [1, 1]} : vector<8x512xf32> to vector<8x16xf32>
    %52 = vector.extract_strided_slice %38 {offsets = [0, 208], sizes = [8, 16], strides = [1, 1]} : vector<8x512xf32> to vector<8x16xf32>
    %53 = vector.extract_strided_slice %38 {offsets = [0, 224], sizes = [8, 16], strides = [1, 1]} : vector<8x512xf32> to vector<8x16xf32>
    %54 = vector.extract_strided_slice %38 {offsets = [0, 240], sizes = [8, 16], strides = [1, 1]} : vector<8x512xf32> to vector<8x16xf32>
    %55 = vector.extract_strided_slice %38 {offsets = [0, 256], sizes = [8, 16], strides = [1, 1]} : vector<8x512xf32> to vector<8x16xf32>
    %56 = vector.extract_strided_slice %38 {offsets = [0, 272], sizes = [8, 16], strides = [1, 1]} : vector<8x512xf32> to vector<8x16xf32>
    %57 = vector.extract_strided_slice %38 {offsets = [0, 288], sizes = [8, 16], strides = [1, 1]} : vector<8x512xf32> to vector<8x16xf32>
    %58 = vector.extract_strided_slice %38 {offsets = [0, 304], sizes = [8, 16], strides = [1, 1]} : vector<8x512xf32> to vector<8x16xf32>
    %59 = vector.extract_strided_slice %38 {offsets = [0, 320], sizes = [8, 16], strides = [1, 1]} : vector<8x512xf32> to vector<8x16xf32>
    %60 = vector.extract_strided_slice %38 {offsets = [0, 336], sizes = [8, 16], strides = [1, 1]} : vector<8x512xf32> to vector<8x16xf32>
    %61 = vector.extract_strided_slice %38 {offsets = [0, 352], sizes = [8, 16], strides = [1, 1]} : vector<8x512xf32> to vector<8x16xf32>
    %62 = vector.extract_strided_slice %38 {offsets = [0, 368], sizes = [8, 16], strides = [1, 1]} : vector<8x512xf32> to vector<8x16xf32>
    %63 = vector.extract_strided_slice %38 {offsets = [0, 384], sizes = [8, 16], strides = [1, 1]} : vector<8x512xf32> to vector<8x16xf32>
    %64 = vector.extract_strided_slice %38 {offsets = [0, 400], sizes = [8, 16], strides = [1, 1]} : vector<8x512xf32> to vector<8x16xf32>
    %65 = vector.extract_strided_slice %38 {offsets = [0, 416], sizes = [8, 16], strides = [1, 1]} : vector<8x512xf32> to vector<8x16xf32>
    %66 = vector.extract_strided_slice %38 {offsets = [0, 432], sizes = [8, 16], strides = [1, 1]} : vector<8x512xf32> to vector<8x16xf32>
    %67 = vector.extract_strided_slice %38 {offsets = [0, 448], sizes = [8, 16], strides = [1, 1]} : vector<8x512xf32> to vector<8x16xf32>
    %68 = vector.extract_strided_slice %38 {offsets = [0, 464], sizes = [8, 16], strides = [1, 1]} : vector<8x512xf32> to vector<8x16xf32>
    %69 = vector.extract_strided_slice %38 {offsets = [0, 480], sizes = [8, 16], strides = [1, 1]} : vector<8x512xf32> to vector<8x16xf32>
    %70 = vector.extract_strided_slice %38 {offsets = [0, 496], sizes = [8, 16], strides = [1, 1]} : vector<8x512xf32> to vector<8x16xf32>
    %71 = tpu.concatenate %39, %40, %41, %42, %43, %44, %45, %46, %47, %48, %49, %50, %51, %52, %53, %54 in 0 : vector<8x16xf32>, vector<8x16xf32>, vector<8x16xf32>, vector<8x16xf32>, vector<8x16xf32>, vector<8x16xf32>, vector<8x16xf32>, vector<8x16xf32>, vector<8x16xf32>, vector<8x16xf32>, vector<8x16xf32>, vector<8x16xf32>, vector<8x16xf32>, vector<8x16xf32>, vector<8x16xf32>, vector<8x16xf32> -> vector<128x16xf32>
    %72 = tpu.concatenate %55, %56, %57, %58, %59, %60, %61, %62, %63, %64, %65, %66, %67, %68, %69, %70 in 0 : vector<8x16xf32>, vector<8x16xf32>, vector<8x16xf32>, vector<8x16xf32>, vector<8x16xf32>, vector<8x16xf32>, vector<8x16xf32>, vector<8x16xf32>, vector<8x16xf32>, vector<8x16xf32>, vector<8x16xf32>, vector<8x16xf32>, vector<8x16xf32>, vector<8x16xf32>, vector<8x16xf32>, vector<8x16xf32> -> vector<128x16xf32>
    %73 = tpu.concatenate %71, %72 in 0 : vector<128x16xf32>, vector<128x16xf32> -> vector<256x16xf32>
    %c0_20 = arith.constant 0 : index
    %c0_21 = arith.constant 0 : index
    %74 = vector.load %arg4[%c0_20, %c0_21] : memref<16x24xf32, #tpu.memory_space<vmem>>, vector<16x24xf32>
    %cst_22 = arith.constant dense<0.000000e+00> : vector<256x24xf32>
    %75 = tpu.matmul %73, %74, %cst_22 {dimension_numbers = #tpu.dot_dimension_numbers<[1], [0], [0], [1], [0, 0, 1, 1], [], []>} : vector<256x16xf32>, vector<16x24xf32>, vector<256x24xf32> -> vector<256x24xf32>
    %c0_23 = arith.constant 0 : index
    %c0_24 = arith.constant 0 : index
    %76 = vector.load %arg5[%c0_23, %c0_24] : memref<256x24xf32, #tpu.memory_space<vmem>>, vector<256x24xf32>
    tpu.vector_store %arg5[%c0_23, %c0_24], %75 {strides = array<i32>} : memref<256x24xf32, #tpu.memory_space<vmem>>, vector<256x24xf32>,
    return
  }
}

</mosaic_0001>

<bundles_post_ra>
// kernel: tpu_custom_call.1
= control target key start
LH: loop header
LB: loop body
LE: loop exit
PB: predicated region body
PF: predicated region fallthrough
CT: control target
= control target key end

     0   :  { %10 = vsyncpa [#allocation3], 0  ;;  %s1775_s18 = smov [#allocation2]   ;;  %s2125_s0 = inlined_call_operand.vmem [shape: f32[4,512], index: 0, kind: input, shape index: {}]   ;;  %s2126_s1 = inlined_call_operand.vmem [shape: f32[32,8], index: 1, kind: input, shape index: {}]   ;;  %s2127_s2 = inlined_call_operand.hbm [shape: f32[3,32,32], index: 2, kind: input, shape index: {}]   ;;  %s2128_s3 = inlined_call_operand.vmem [shape: f32[8,33], index: 3, kind: input, shape index: {}]   ;;  %s2129_s4 = inlined_call_operand.vmem [shape: f32[16,24], index: 4, kind: input, shape index: {}]   ;;  %s2130_s5 = inlined_call_operand.vmem [shape: f32[256,24], index: 5, kind: output, shape index: {}]  }
   0x1   :  { %s20_s19 = sshll.u32 %s1775_s18, 4  ;;  %s1751_s22 = scalar_lea.hbm %s2127_s2, 1536  ;;  %s21_s19 = int_to_ptr.vmem [resolvable:$true] %s20_s19 }
   0x2   :  { %p1752_p0 = scmp.ne.s32.totalorder %s2127_s2, %s1751_s22  ;;  %p1755_p1 = scmp.lt.u32.totalorder %s1751_s22, %s2127_s2 }
   0x4   :  { %p1757_p2 = pnand %p1755_p1, %p1752_p0 }
   0x6   :  { %1760 = shalt.err (!%p1757_p2)
}
   0x7   :  { %s1761_s27 = scalar_lea.vmem %s21_s19, 1536  ;;  %p1766_p4 = scmp.lt.s32.totalorder %s21_s19, %s21_s19 }
   0x8   :  { %p1762_p3 = scmp.ne.s32.totalorder %s21_s19, %s1761_s27  ;;  %p1767_p5 = scmp.lt.s32.totalorder %s1761_s27, %s1761_s27 }
   0xa   :  { %p1768_p6 = por %p1767_p5, %p1766_p4 }
   0xc   :  { %p1769_p7 = pnand %p1768_p6, %p1762_p3 }
   0xe   :  { %1772 = shalt.err (!%p1769_p7)
}
   0xf   :  { %s1776_s28 = smov 128   ;;  %s1777_s29 = smov 8  }
  0x10   :  { %26 = dma.hbm_to_vmem [thread:$0]  %s2127_s2, 1536, %s21_s19, [#allocation3], %s1776_s28, %s1776_s28, %s1777_s29  }
  0x11   :  { %1773 = dma.done.wait [#allocation3], 1536  }
  0x12   :  { %1774 = vsyncadd [#allocation3], 4294965760  ;;  %v1778_v0 = vmov 0.0   ;;  %v1779_v1 = vmov 4   ;;  %v34_v2 = vld [vmem:[%s2125_s0] sm:$0xff]  ;;  %vm73_vm0 = vcmask 1043456  }
  0x13   :  { %146 = vmatprep.mubr.f32.mxu0 %v1778_v0  ;;  %235 = vmatprep.mubr.f32.mxu1 %v1778_v0  ;;  %v35_v3 = vld [vmem:[%s2125_s0 + $0x8] sm:$0xff]  ;;  %v1844_v4 = vld [vmem:[%s2126_s1] sm:$0xff]  ;;  %v62_v5 = vcombine.high %v34_v2, %v34_v2  ;;  %v1849_v7 = vld [vmem:[%s2126_s1 + $0x10] sm:$0xff]  ;;  %vm64_vm1 = vcmask 31744   ;;  %v1780_v10 = vmov 5   ;;  %vm296_vm2 = vcmask 261120  }
  0x14   :  { %1739 = vset.pattern.permute.xlu0 %v1779_v1  ;;  %1740 = vset.pattern.permute.xlu1 %v1779_v1  ;;  %v63_v6 = vcombine.high %v35_v3, %v35_v3  ;;  %v1862_v8 = vld [vmem:[%s2126_s1 + $0x8] sm:$0xff]  ;;  %v1867_v9 = vld [vmem:[%s2126_s1 + $0x18] sm:$0xff]  ;;  %vm1169_vm3 = vcmask 130048   ;;  %s1784_s21 = smov 112   ;;  %s1786_s22 = smov 80   ;;  %vm1459_vm4 = vcmask 195584  }
  0x15   :  { %42 = vperm.xlu0 %1739, %v1844_v4   ;;  %52 = vperm.xlu1 %1740, %v1849_v7   ;;  %s1787_s23 = smov 64   ;;  %s1788_s24 = smov 48  }
  0x16   :  { %1497 = vmatprep.subr.msk.mxu0 %vm73_vm0, %v62_v5  ;;  %1503 = vmatprep.subr.msk.mxu1 %vm73_vm0, %v63_v6  ;;  %s1789_s25 = smov 32   ;;  %s1790_s26 = smov 16  }
  0x17   :  { %1498 = vmatpush1.msk.msra.mxu0 %vm73_vm0, %v34_v2  ;;  %1504 = vmatpush1.msk.msra.mxu1 %vm73_vm0, %v35_v3 }
  0x18   :  { %1499 = vmatmul.mubr.msk.f32.vlgmr.msra.gmra.mrb[0].mxu0 %vm64_vm1, %v1844_v4  ;;  %1505 = vmatmul.mubr.msk.f32.vlgmr.msra.gmra.mrb[0].mxu1 %vm64_vm1, %v1844_v4 }
  0x19   :  { %152 = vmatprep.mubr.f32.mxu0 %v1778_v0  ;;  %241 = vmatprep.mubr.f32.mxu1 %v1778_v0 }
  0x1a   :  { %47 = vperm.xlu0 %1739, %v1862_v8   ;;  %57 = vperm.xlu1 %1740, %v1867_v9  }
  0x1c   :  { %1500 = vmatmul.mubr.msk.f32.gmra.mrb[2].mxu0 %vm64_vm1, %v1862_v8  ;;  %1506 = vmatmul.mubr.msk.f32.gmra.mrb[2].mxu1 %vm64_vm1, %v1862_v8 }
  0x1d   :  { %158 = vmatprep.mubr.f32.mxu0 %v1778_v0  ;;  %247 = vmatprep.mubr.f32.mxu1 %v1778_v0 }
  0x1e   :  { %1741 = vset.pattern.permute.xlu0 %v1780_v10  ;;  %1742 = vset.pattern.permute.xlu1 %v1780_v10 }
  0x1f   :  { %281 = vperm.xlu0 %1741, %v1844_v4   ;;  %285 = vperm.xlu1 %1742, %v1862_v8  }
  0x20   :  { %1501 = vmatmul.mubr.msk.f32.gmra.mrb[4].mxu0 %vm64_vm1, %v1849_v7  ;;  %1507 = vmatmul.mubr.msk.f32.gmra.mrb[4].mxu1 %vm64_vm1, %v1849_v7 }
  0x21   :  { %164 = vmatprep.mubr.f32.mxu0 %v1778_v0  ;;  %253 = vmatprep.mubr.f32.mxu1 %v1778_v0 }
  0x23   :  { %289 = vperm.xlu1 %1742, %v1849_v7   ;;  %293 = vperm.xlu0 %1741, %v1867_v9  }
  0x24   :  { %1502 = vmatmul.mubr.msk.f32.gmra.mrb[6].mxu0 %vm64_vm1, %v1867_v9  ;;  %1508 = vmatmul.mubr.msk.f32.gmra.mrb[6].mxu1 %vm64_vm1, %v1867_v9 }
  0x25   :  { %373 = vmatprep.mubr.f32.mxu0 %v1778_v0  ;;  %462 = vmatprep.mubr.f32.mxu1 %v1778_v0 }
  0x94   :  { %v43_v11 = vpop.permute.xlu0 %42  ;;  %v53_v19 = vpop.permute.xlu1 %52 }
  0x99   :  { %v48_v16 = vpop.permute.xlu0 %47  ;;  %v58_v48 = vpop.permute.xlu1 %57 }
  0xeb   :  { %v148_v12 = vpop.f32.mrb[0].mxu0  ;;  %v237_v13 = vpop.f32.mrb[0].mxu1 }
  0xec   :  { %v150_v14 = vpop.f32.mrb[1].mxu0  ;;  %v239_v15 = vpop.f32.mrb[1].mxu1  ;;  %v149_v17 = vadd.f32 %v148_v12, %v43_v11  ;;  %v238_v18 = vadd.f32 %v237_v13, %v43_v11  ;;  %v276_v12 = vld [vmem:[#allocation2] sm:$0xff]  ;;  %v277_v13 = vld [vmem:[#allocation2 + $0x8] sm:$0xff] }
  0xed   :  { %v151_v20 = vadd.f32 %v150_v14, %v43_v11  ;;  %v240_v21 = vadd.f32 %v239_v15, %v43_v11  ;;  %v278_v14 = vld [vmem:[#allocation2 + $0x10] sm:$0xff]  ;;  %v279_v15 = vld [vmem:[#allocation2 + $0x18] sm:$0xff] }
  0xee   :  { %v260_v30 = vmax.f32 %v149_v17, 0.0  ;;  %v262_v31 = vmax.f32 %v238_v18, 0.0  ;;  %v282_v17 = vpop.permute.xlu0 %281  ;;  %v286_v18 = vpop.permute.xlu1 %285 }
  0xef   :  { %v154_v22 = vpop.f32.mrb[2].mxu0  ;;  %v243_v23 = vpop.f32.mrb[2].mxu1  ;;  %v261_v34 = vmax.f32 %v151_v20, 0.0  ;;  %v263_v35 = vmax.f32 %v240_v21, 0.0 }
  0xf0   :  { %v155_v24 = vadd.f32 %v154_v22, %v48_v16  ;;  %v244_v25 = vadd.f32 %v243_v23, %v48_v16  ;;  %v156_v26 = vpop.f32.mrb[3].mxu0  ;;  %v245_v27 = vpop.f32.mrb[3].mxu1 }
  0xf1   :  { %v157_v28 = vadd.f32 %v156_v26, %v48_v16  ;;  %v246_v29 = vadd.f32 %v245_v27, %v48_v16  ;;  %v1781_v16 = vmov 6  }
  0xf2   :  { %v264_v32 = vmax.f32 %v155_v24, 0.0  ;;  %v266_v33 = vmax.f32 %v244_v25, 0.0  ;;  %1743 = vset.pattern.permute.xlu1 %v1781_v16  ;;  %1744 = vset.pattern.permute.xlu0 %v1781_v16 }
  0xf3   :  { %v265_v36 = vmax.f32 %v157_v28, 0.0  ;;  %v267_v37 = vmax.f32 %v246_v29, 0.0  ;;  %v160_v38 = vpop.f32.mrb[4].mxu0  ;;  %v249_v39 = vpop.f32.mrb[4].mxu1  ;;  %509 = vperm.xlu1 %1743, %v1844_v4   ;;  %513 = vperm.xlu0 %1744, %v1862_v8  }
  0xf4   :  { %v1655_v40 = vpack.c.bf16 %v264_v32, %v260_v30  ;;  %v1663_v41 = vpack.c.bf16 %v266_v33, %v262_v31  ;;  %v162_v42 = vpop.f32.mrb[5].mxu0  ;;  %v251_v43 = vpop.f32.mrb[5].mxu1  ;;  %v161_v46 = vadd.f32 %v160_v38, %v53_v19  ;;  %v250_v47 = vadd.f32 %v249_v39, %v53_v19 }
  0xf5   :  { %v1653_v44 = vpack.c.bf16 %v265_v36, %v261_v34  ;;  %v1661_v45 = vpack.c.bf16 %v267_v37, %v263_v35  ;;  %v163_v49 = vadd.f32 %v162_v42, %v53_v19  ;;  %v252_v50 = vadd.f32 %v251_v43, %v53_v19  ;;  %v290_v39 = vpop.permute.xlu1 %289 }
  0xf6   :  { %v268_v59 = vmax.f32 %v161_v46, 0.0  ;;  %v270_v60 = vmax.f32 %v250_v47, 0.0 }
  0xf7   :  { %v166_v51 = vpop.f32.mrb[6].mxu0  ;;  %v255_v52 = vpop.f32.mrb[6].mxu1  ;;  %1654 = vmatprep.subr.bf16.mxu0 %v1653_v44  ;;  %1662 = vmatprep.subr.bf16.mxu1 %v1661_v45  ;;  %v269_v63 = vmax.f32 %v163_v49, 0.0  ;;  %v271_v1 = vmax.f32 %v252_v50, 0.0 }
  0xf8   :  { %v167_v53 = vadd.f32 %v166_v51, %v58_v48  ;;  %v256_v54 = vadd.f32 %v255_v52, %v58_v48  ;;  %v168_v55 = vpop.f32.mrb[7].mxu0  ;;  %v257_v56 = vpop.f32.mrb[7].mxu1  ;;  %1656 = vmatpush1.bf16.msra.mxu0 %v1655_v40  ;;  %1664 = vmatpush1.bf16.msra.mxu1 %v1663_v41 }
  0xf9   :  { %v169_v57 = vadd.f32 %v168_v55, %v58_v48  ;;  %v258_v58 = vadd.f32 %v257_v56, %v58_v48  ;;  %517 = vperm.xlu1 %1743, %v1849_v7   ;;  %v294_v52 = vpop.permute.xlu0 %293 }
  0xfa   :  { %v272_v61 = vmax.f32 %v167_v53, 0.0  ;;  %v274_v62 = vmax.f32 %v256_v54, 0.0 }
  0xfb   :  { %v273_v2 = vmax.f32 %v169_v57, 0.0  ;;  %v275_v3 = vmax.f32 %v258_v58, 0.0 }
  0xfc   :  { %v1659_v5 = vpack.c.bf16 %v272_v61, %v268_v59  ;;  %v1667_v6 = vpack.c.bf16 %v274_v62, %v270_v60 }
  0xfd   :  { %v1657_v10 = vpack.c.bf16 %v273_v2, %v269_v63  ;;  %v1665_v11 = vpack.c.bf16 %v275_v3, %v271_v1  ;;  %521 = vperm.xlu1 %1743, %v1867_v9  }
  0xff   :  { %1658 = vmatprep.subr.bf16.mxu0 %v1657_v10  ;;  %1666 = vmatprep.subr.bf16.mxu1 %v1665_v11 }
 0x100   :  { %1660 = vmatpush1.bf16.msra.mxu0 %v1659_v5  ;;  %1668 = vmatpush1.bf16.msra.mxu1 %v1667_v6 }
 0x103   :  { %1509 = vmatmul.mubr.msk.f32.vlgmr.msra.gmra.mrb[8].mxu0 %vm296_vm2, %v276_v12  ;;  %1513 = vmatmul.mubr.msk.f32.vlgmr.msra.gmra.mrb[8].mxu1 %vm296_vm2, %v276_v12 }
 0x104   :  { %379 = vmatprep.mubr.f32.mxu0 %v1778_v0  ;;  %468 = vmatprep.mubr.f32.mxu1 %v1778_v0 }
 0x107   :  { %1510 = vmatmul.mubr.msk.f32.gmra.mrb[10].mxu0 %vm296_vm2, %v277_v13  ;;  %1514 = vmatmul.mubr.msk.f32.gmra.mrb[10].mxu1 %vm296_vm2, %v277_v13 }
 0x108   :  { %385 = vmatprep.mubr.f32.mxu0 %v1778_v0  ;;  %474 = vmatprep.mubr.f32.mxu1 %v1778_v0 }
 0x10b   :  { %1511 = vmatmul.mubr.msk.f32.gmra.mrb[12].mxu0 %vm296_vm2, %v278_v14  ;;  %1515 = vmatmul.mubr.msk.f32.gmra.mrb[12].mxu1 %vm296_vm2, %v278_v14 }
 0x10c   :  { %391 = vmatprep.mubr.f32.mxu0 %v1778_v0  ;;  %480 = vmatprep.mubr.f32.mxu1 %v1778_v0 }
 0x10f   :  { %1512 = vmatmul.mubr.msk.f32.gmra.mrb[14].mxu0 %vm296_vm2, %v279_v15  ;;  %1516 = vmatmul.mubr.msk.f32.gmra.mrb[14].mxu1 %vm296_vm2, %v279_v15 }
 0x110   :  { %600 = vmatprep.mubr.f32.mxu0 %v1778_v0  ;;  %689 = vmatprep.mubr.f32.mxu1 %v1778_v0 }
 0x1d6   :  { %v375_v19 = vpop.f32.mrb[8].mxu0  ;;  %v464_v20 = vpop.f32.mrb[8].mxu1 }
 0x1d7   :  { %v377_v21 = vpop.f32.mrb[9].mxu0  ;;  %v466_v22 = vpop.f32.mrb[9].mxu1  ;;  %v376_v23 = vadd.f32 %v375_v19, %v282_v17  ;;  %v465_v24 = vadd.f32 %v464_v20, %v282_v17  ;;  %v505_v19 = vld [vmem:[#allocation2 + $0x28] sm:$0xff]  ;;  %v506_v20 = vld [vmem:[#allocation2 + $0x30] sm:$0xff] }
 0x1d8   :  { %v378_v25 = vadd.f32 %v377_v21, %v282_v17  ;;  %v467_v26 = vadd.f32 %v466_v22, %v282_v17  ;;  %v507_v21 = vld [vmem:[#allocation2 + $0x38] sm:$0xff]  ;;  %v1782_v22 = vmov 7  }
 0x1d9   :  { %v487_v35 = vmax.f32 %v376_v23, 0.0  ;;  %v489_v36 = vmax.f32 %v465_v24, 0.0  ;;  %1745 = vset.pattern.permute.xlu0 %v1782_v22  ;;  %1746 = vset.pattern.permute.xlu1 %v1782_v22  ;;  %v510_v23 = vpop.permute.xlu1 %509  ;;  %v733_v22 = vld [vmem:[#allocation2 + $0x50] sm:$0xff] }
 0x1da   :  { %v381_v27 = vpop.f32.mrb[10].mxu0  ;;  %v470_v28 = vpop.f32.mrb[10].mxu1  ;;  %v488_v40 = vmax.f32 %v378_v25, 0.0  ;;  %v490_v41 = vmax.f32 %v467_v26, 0.0  ;;  %736 = vperm.xlu0 %1745, %v1844_v4   ;;  %740 = vperm.xlu1 %1746, %v1862_v8  }
 0x1db   :  { %v382_v29 = vadd.f32 %v381_v27, %v286_v18  ;;  %v471_v30 = vadd.f32 %v470_v28, %v286_v18  ;;  %v383_v31 = vpop.f32.mrb[11].mxu0  ;;  %v472_v32 = vpop.f32.mrb[11].mxu1 }
 0x1dc   :  { %v384_v33 = vadd.f32 %v383_v31, %v286_v18  ;;  %v473_v34 = vadd.f32 %v472_v32, %v286_v18  ;;  %v504_v18 = vld [vmem:[#allocation2 + $0x20] sm:$0xff]  ;;  %v514_v28 = vpop.permute.xlu0 %513 }
 0x1dd   :  { %v491_v37 = vmax.f32 %v382_v29, 0.0  ;;  %v493_v38 = vmax.f32 %v471_v30, 0.0  ;;  %v518_v31 = vpop.permute.xlu1 %517 }
 0x1de   :  { %v492_v42 = vmax.f32 %v384_v33, 0.0  ;;  %v494_v43 = vmax.f32 %v473_v34, 0.0  ;;  %v387_v44 = vpop.f32.mrb[12].mxu0  ;;  %v476_v45 = vpop.f32.mrb[12].mxu1  ;;  %744 = vperm.xlu1 %1746, %v1849_v7   ;;  %748 = vperm.xlu0 %1745, %v1867_v9  }
 0x1df   :  { %v1671_v46 = vpack.c.bf16 %v491_v37, %v487_v35  ;;  %v1679_v47 = vpack.c.bf16 %v493_v38, %v489_v36  ;;  %v389_v48 = vpop.f32.mrb[13].mxu0  ;;  %v478_v49 = vpop.f32.mrb[13].mxu1  ;;  %v388_v53 = vadd.f32 %v387_v44, %v290_v39  ;;  %v477_v54 = vadd.f32 %v476_v45, %v290_v39 }
 0x1e0   :  { %v1669_v50 = vpack.c.bf16 %v492_v42, %v488_v40  ;;  %v1677_v51 = vpack.c.bf16 %v494_v43, %v490_v41  ;;  %v390_v55 = vadd.f32 %v389_v48, %v290_v39  ;;  %v479_v56 = vadd.f32 %v478_v49, %v290_v39 }
 0x1e1   :  { %v495_v2 = vmax.f32 %v388_v53, 0.0  ;;  %v497_v3 = vmax.f32 %v477_v54, 0.0  ;;  %v522_v54 = vpop.permute.xlu1 %521 }
 0x1e2   :  { %v393_v57 = vpop.f32.mrb[14].mxu0  ;;  %v482_v58 = vpop.f32.mrb[14].mxu1  ;;  %1670 = vmatprep.subr.bf16.mxu0 %v1669_v50  ;;  %1678 = vmatprep.subr.bf16.mxu1 %v1677_v51  ;;  %v496_v10 = vmax.f32 %v390_v55, 0.0  ;;  %v498_v11 = vmax.f32 %v479_v56, 0.0 }
 0x1e3   :  { %v394_v59 = vadd.f32 %v393_v57, %v294_v52  ;;  %v483_v60 = vadd.f32 %v482_v58, %v294_v52  ;;  %v395_v61 = vpop.f32.mrb[15].mxu0  ;;  %v484_v62 = vpop.f32.mrb[15].mxu1  ;;  %1672 = vmatpush1.bf16.msra.mxu0 %v1671_v46  ;;  %1680 = vmatpush1.bf16.msra.mxu1 %v1679_v47 }
 0x1e4   :  { %v396_v63 = vadd.f32 %v395_v61, %v294_v52  ;;  %v485_v1 = vadd.f32 %v484_v62, %v294_v52 }
 0x1e5   :  { %v499_v5 = vmax.f32 %v394_v59, 0.0  ;;  %v501_v6 = vmax.f32 %v483_v60, 0.0 }
 0x1e6   :  { %v500_v12 = vmax.f32 %v396_v63, 0.0  ;;  %v502_v13 = vmax.f32 %v485_v1, 0.0 }
 0x1e7   :  { %v1675_v14 = vpack.c.bf16 %v499_v5, %v495_v2  ;;  %v1683_v15 = vpack.c.bf16 %v501_v6, %v497_v3 }
 0x1e8   :  { %v1673_v16 = vpack.c.bf16 %v500_v12, %v496_v10  ;;  %v1681_v17 = vpack.c.bf16 %v502_v13, %v498_v11 }
 0x1ea   :  { %1674 = vmatprep.subr.bf16.mxu0 %v1673_v16  ;;  %1682 = vmatprep.subr.bf16.mxu1 %v1681_v17 }
 0x1eb   :  { %1676 = vmatpush1.bf16.msra.mxu0 %v1675_v14  ;;  %1684 = vmatpush1.bf16.msra.mxu1 %v1683_v15 }
 0x1ee   :  { %1517 = vmatmul.mubr.msk.f32.vlgmr.msra.gmra.mrb[16].mxu0 %vm296_vm2, %v504_v18  ;;  %1521 = vmatmul.mubr.msk.f32.vlgmr.msra.gmra.mrb[16].mxu1 %vm296_vm2, %v504_v18 }
 0x1ef   :  { %606 = vmatprep.mubr.f32.mxu0 %v1778_v0  ;;  %695 = vmatprep.mubr.f32.mxu1 %v1778_v0 }
 0x1f2   :  { %1518 = vmatmul.mubr.msk.f32.gmra.mrb[18].mxu0 %vm296_vm2, %v505_v19  ;;  %1522 = vmatmul.mubr.msk.f32.gmra.mrb[18].mxu1 %vm296_vm2, %v505_v19 }
 0x1f3   :  { %612 = vmatprep.mubr.f32.mxu0 %v1778_v0  ;;  %701 = vmatprep.mubr.f32.mxu1 %v1778_v0 }
 0x1f6   :  { %1519 = vmatmul.mubr.msk.f32.gmra.mrb[20].mxu0 %vm296_vm2, %v506_v20  ;;  %1523 = vmatmul.mubr.msk.f32.gmra.mrb[20].mxu1 %vm296_vm2, %v506_v20  ;;  %v731_v20 = vld [vmem:[#allocation2 + $0x40] sm:$0xff] }
 0x1f7   :  { %618 = vmatprep.mubr.f32.mxu0 %v1778_v0  ;;  %707 = vmatprep.mubr.f32.mxu1 %v1778_v0 }
 0x1fa   :  { %1520 = vmatmul.mubr.msk.f32.gmra.mrb[22].mxu0 %vm296_vm2, %v507_v21  ;;  %1524 = vmatmul.mubr.msk.f32.gmra.mrb[22].mxu1 %vm296_vm2, %v507_v21  ;;  %v732_v21 = vld [vmem:[#allocation2 + $0x48] sm:$0xff] }
 0x1fb   :  { %827 = vmatprep.mubr.f32.mxu0 %v1778_v0  ;;  %916 = vmatprep.mubr.f32.mxu1 %v1778_v0 }
 0x2c1   :  { %v602_v24 = vpop.f32.mrb[16].mxu0  ;;  %v691_v25 = vpop.f32.mrb[16].mxu1 }
 0x2c2   :  { %v604_v26 = vpop.f32.mrb[17].mxu0  ;;  %v693_v27 = vpop.f32.mrb[17].mxu1  ;;  %v603_v29 = vadd.f32 %v602_v24, %v510_v23  ;;  %v692_v30 = vadd.f32 %v691_v25, %v510_v23  ;;  %v1952_v24 = vld [vmem:[%s2128_s3] sm:$0xff]  ;;  %v1783_v25 = vmov 32  }
 0x2c3   :  { %v605_v32 = vadd.f32 %v604_v26, %v510_v23  ;;  %v694_v33 = vadd.f32 %v693_v27, %v510_v23  ;;  %v734_v23 = vld [vmem:[#allocation2 + $0x58] sm:$0xff]  ;;  %1747 = vset.pattern.permute.xlu1 %v1783_v25  ;;  %1748 = vset.pattern.permute.xlu0 %v1783_v25  ;;  %v737_v26 = vpop.permute.xlu0 %736  ;;  %v741_v27 = vpop.permute.xlu1 %740 }
 0x2c4   :  { %v714_v9 = vmax.f32 %v603_v29, 0.0  ;;  %v716_v39 = vmax.f32 %v692_v30, 0.0  ;;  %960 = vperm.xlu1 %1747, %v1952_v24  }
 0x2c5   :  { %v608_v34 = vpop.f32.mrb[18].mxu0  ;;  %v697_v35 = vpop.f32.mrb[18].mxu1  ;;  %v715_v42 = vmax.f32 %v605_v32, 0.0  ;;  %v717_v43 = vmax.f32 %v694_v33, 0.0 }
 0x2c6   :  { %v609_v4 = vadd.f32 %v608_v34, %v514_v28  ;;  %v698_v36 = vadd.f32 %v697_v35, %v514_v28  ;;  %v610_v8 = vpop.f32.mrb[19].mxu0  ;;  %v699_v37 = vpop.f32.mrb[19].mxu1 }
 0x2c7   :  { %v611_v7 = vadd.f32 %v610_v8, %v514_v28  ;;  %v700_v38 = vadd.f32 %v699_v37, %v514_v28 }
 0x2c8   :  { %v718_v40 = vmax.f32 %v609_v4, 0.0  ;;  %v720_v41 = vmax.f32 %v698_v36, 0.0 }
 0x2c9   :  { %v719_v44 = vmax.f32 %v611_v7, 0.0  ;;  %v721_v45 = vmax.f32 %v700_v38, 0.0  ;;  %v614_v46 = vpop.f32.mrb[20].mxu0  ;;  %v703_v47 = vpop.f32.mrb[20].mxu1 }
 0x2ca   :  { %v1687_v48 = vpack.c.bf16 %v718_v40, %v714_v9  ;;  %v1695_v49 = vpack.c.bf16 %v720_v41, %v716_v39  ;;  %v616_v50 = vpop.f32.mrb[21].mxu0  ;;  %v705_v51 = vpop.f32.mrb[21].mxu1  ;;  %v615_v55 = vadd.f32 %v614_v46, %v518_v31  ;;  %v704_v56 = vadd.f32 %v703_v47, %v518_v31 }
 0x2cb   :  { %v1685_v52 = vpack.c.bf16 %v719_v44, %v715_v42  ;;  %v1693_v53 = vpack.c.bf16 %v721_v45, %v717_v43  ;;  %v617_v57 = vadd.f32 %v616_v50, %v518_v31  ;;  %v706_v58 = vadd.f32 %v705_v51, %v518_v31  ;;  %v745_v43 = vpop.permute.xlu1 %744 }
 0x2cc   :  { %v722_v5 = vmax.f32 %v615_v55, 0.0  ;;  %v724_v6 = vmax.f32 %v704_v56, 0.0  ;;  %v749_v56 = vpop.permute.xlu0 %748 }
 0x2cd   :  { %v620_v59 = vpop.f32.mrb[22].mxu0  ;;  %v709_v60 = vpop.f32.mrb[22].mxu1  ;;  %1686 = vmatprep.subr.bf16.mxu0 %v1685_v52  ;;  %1694 = vmatprep.subr.bf16.mxu1 %v1693_v53  ;;  %v723_v12 = vmax.f32 %v617_v57, 0.0  ;;  %v725_v13 = vmax.f32 %v706_v58, 0.0 }
 0x2ce   :  { %v621_v61 = vadd.f32 %v620_v59, %v522_v54  ;;  %v710_v62 = vadd.f32 %v709_v60, %v522_v54  ;;  %v622_v63 = vpop.f32.mrb[23].mxu0  ;;  %v711_v1 = vpop.f32.mrb[23].mxu1  ;;  %1688 = vmatpush1.bf16.msra.mxu0 %v1687_v48  ;;  %1696 = vmatpush1.bf16.msra.mxu1 %v1695_v49 }
 0x2cf   :  { %v623_v2 = vadd.f32 %v622_v63, %v522_v54  ;;  %v712_v3 = vadd.f32 %v711_v1, %v522_v54 }
 0x2d0   :  { %v726_v10 = vmax.f32 %v621_v61, 0.0  ;;  %v728_v11 = vmax.f32 %v710_v62, 0.0 }
 0x2d1   :  { %v727_v14 = vmax.f32 %v623_v2, 0.0  ;;  %v729_v15 = vmax.f32 %v712_v3, 0.0 }
 0x2d2   :  { %v1691_v16 = vpack.c.bf16 %v726_v10, %v722_v5  ;;  %v1699_v17 = vpack.c.bf16 %v728_v11, %v724_v6 }
 0x2d3   :  { %v1689_v18 = vpack.c.bf16 %v727_v14, %v723_v12  ;;  %v1697_v19 = vpack.c.bf16 %v729_v15, %v725_v13 }
 0x2d5   :  { %1690 = vmatprep.subr.bf16.mxu0 %v1689_v18  ;;  %1698 = vmatprep.subr.bf16.mxu1 %v1697_v19 }
 0x2d6   :  { %1692 = vmatpush1.bf16.msra.mxu0 %v1691_v16  ;;  %1700 = vmatpush1.bf16.msra.mxu1 %v1699_v17 }
 0x2d9   :  { %1525 = vmatmul.mubr.msk.f32.vlgmr.msra.gmra.mrb[24].mxu0 %vm296_vm2, %v731_v20  ;;  %1529 = vmatmul.mubr.msk.f32.vlgmr.msra.gmra.mrb[24].mxu1 %vm296_vm2, %v731_v20 }
 0x2da   :  { %833 = vmatprep.mubr.f32.mxu0 %v1778_v0  ;;  %922 = vmatprep.mubr.f32.mxu1 %v1778_v0 }
 0x2dd   :  { %1526 = vmatmul.mubr.msk.f32.gmra.mrb[26].mxu0 %vm296_vm2, %v732_v21  ;;  %1530 = vmatmul.mubr.msk.f32.gmra.mrb[26].mxu1 %vm296_vm2, %v732_v21 }
 0x2de   :  { %839 = vmatprep.mubr.f32.mxu0 %v1778_v0  ;;  %928 = vmatprep.mubr.f32.mxu1 %v1778_v0 }
 0x2e1   :  { %1527 = vmatmul.mubr.msk.f32.gmra.mrb[28].mxu0 %vm296_vm2, %v733_v22  ;;  %1531 = vmatmul.mubr.msk.f32.gmra.mrb[28].mxu1 %vm296_vm2, %v733_v22  ;;  %v1167_v22 = vld [vmem:[%s2129_s4] sm:$0xff] }
 0x2e2   :  { %845 = vmatprep.mubr.f32.mxu0 %v1778_v0  ;;  %934 = vmatprep.mubr.f32.mxu1 %v1778_v0 }
 0x2e5   :  { %1528 = vmatmul.mubr.msk.f32.gmra.mrb[30].mxu0 %vm296_vm2, %v734_v23  ;;  %1532 = vmatmul.mubr.msk.f32.gmra.mrb[30].mxu1 %vm296_vm2, %v734_v23  ;;  %v1168_v23 = vld [vmem:[%s2129_s4 + $0x8] sm:$0xff]  ;;  %s1785_s4 = smov 96  }
 0x2e6   :  { %1029 = vmatprep.mubr.f32.mxu0 %v1778_v0  ;;  %1100 = vmatprep.mubr.f32.mxu1 %v1778_v0  ;;  %v1717_v25 = vpack.c.bf16 %v1168_v23, %v1167_v22 }
 0x3ac   :  { %v829_v28 = vpop.f32.mrb[24].mxu0  ;;  %v918_v29 = vpop.f32.mrb[24].mxu1 }
 0x3ad   :  { %v831_v30 = vpop.f32.mrb[25].mxu0  ;;  %v920_v31 = vpop.f32.mrb[25].mxu1  ;;  %v830_v32 = vadd.f32 %v829_v28, %v737_v26  ;;  %v919_v33 = vadd.f32 %v918_v29, %v737_v26 }
 0x3ae   :  { %v832_v34 = vadd.f32 %v831_v30, %v737_v26  ;;  %v921_v0 = vadd.f32 %v920_v31, %v737_v26  ;;  %v961_v26 = vpop.permute.xlu1 %960 }
 0x3af   :  { %v941_v39 = vmax.f32 %v830_v32, 0.0  ;;  %v943_v40 = vmax.f32 %v919_v33, 0.0 }
 0x3b0   :  { %v835_v35 = vpop.f32.mrb[26].mxu0  ;;  %v924_v4 = vpop.f32.mrb[26].mxu1  ;;  %v942_v44 = vmax.f32 %v832_v34, 0.0  ;;  %v944_v45 = vmax.f32 %v921_v0, 0.0 }
 0x3b1   :  { %v836_v36 = vadd.f32 %v835_v35, %v741_v27  ;;  %v925_v8 = vadd.f32 %v924_v4, %v741_v27  ;;  %v837_v37 = vpop.f32.mrb[27].mxu0  ;;  %v926_v7 = vpop.f32.mrb[27].mxu1 }
 0x3b2   :  { %v838_v38 = vadd.f32 %v837_v37, %v741_v27  ;;  %v927_v9 = vadd.f32 %v926_v7, %v741_v27 }
 0x3b3   :  { %v945_v41 = vmax.f32 %v836_v36, 0.0  ;;  %v947_v42 = vmax.f32 %v925_v8, 0.0 }
 0x3b4   :  { %v946_v46 = vmax.f32 %v838_v38, 0.0  ;;  %v948_v47 = vmax.f32 %v927_v9, 0.0  ;;  %v841_v48 = vpop.f32.mrb[28].mxu0  ;;  %v930_v49 = vpop.f32.mrb[28].mxu1 }
 0x3b5   :  { %v1703_v50 = vpack.c.bf16 %v945_v41, %v941_v39  ;;  %v1711_v51 = vpack.c.bf16 %v947_v42, %v943_v40  ;;  %v843_v52 = vpop.f32.mrb[29].mxu0  ;;  %v932_v53 = vpop.f32.mrb[29].mxu1  ;;  %v842_v57 = vadd.f32 %v841_v48, %v745_v43  ;;  %v931_v58 = vadd.f32 %v930_v49, %v745_v43 }
 0x3b6   :  { %v1701_v54 = vpack.c.bf16 %v946_v46, %v942_v44  ;;  %v1709_v55 = vpack.c.bf16 %v948_v47, %v944_v45  ;;  %v844_v59 = vadd.f32 %v843_v52, %v745_v43  ;;  %v933_v60 = vadd.f32 %v932_v53, %v745_v43 }
 0x3b7   :  { %v949_v10 = vmax.f32 %v842_v57, 0.0  ;;  %v951_v11 = vmax.f32 %v931_v58, 0.0 }
 0x3b8   :  { %v847_v61 = vpop.f32.mrb[30].mxu0  ;;  %v936_v62 = vpop.f32.mrb[30].mxu1  ;;  %1702 = vmatprep.subr.bf16.mxu0 %v1701_v54  ;;  %1710 = vmatprep.subr.bf16.mxu1 %v1709_v55  ;;  %v950_v14 = vmax.f32 %v844_v59, 0.0  ;;  %v952_v15 = vmax.f32 %v933_v60, 0.0 }
 0x3b9   :  { %v848_v63 = vadd.f32 %v847_v61, %v749_v56  ;;  %v937_v1 = vadd.f32 %v936_v62, %v749_v56  ;;  %v849_v2 = vpop.f32.mrb[31].mxu0  ;;  %v938_v3 = vpop.f32.mrb[31].mxu1  ;;  %1704 = vmatpush1.bf16.msra.mxu0 %v1703_v50  ;;  %1712 = vmatpush1.bf16.msra.mxu1 %v1711_v51 }
 0x3ba   :  { %v850_v5 = vadd.f32 %v849_v2, %v749_v56  ;;  %v939_v6 = vadd.f32 %v938_v3, %v749_v56 }
 0x3bb   :  { %v953_v12 = vmax.f32 %v848_v63, 0.0  ;;  %v955_v13 = vmax.f32 %v937_v1, 0.0 }
 0x3bc   :  { %v954_v16 = vmax.f32 %v850_v5, 0.0  ;;  %v956_v17 = vmax.f32 %v939_v6, 0.0 }
 0x3bd   :  { %v1707_v18 = vpack.c.bf16 %v953_v12, %v949_v10  ;;  %v1715_v19 = vpack.c.bf16 %v955_v13, %v951_v11 }
 0x3be   :  { %v1705_v20 = vpack.c.bf16 %v954_v16, %v950_v14  ;;  %v1713_v21 = vpack.c.bf16 %v956_v17, %v952_v15 }
 0x3c0   :  { %1706 = vmatprep.subr.bf16.mxu0 %v1705_v20  ;;  %1714 = vmatprep.subr.bf16.mxu1 %v1713_v21 }
 0x3c1   :  { %1708 = vmatpush1.bf16.msra.mxu0 %v1707_v18  ;;  %1716 = vmatpush1.bf16.msra.mxu1 %v1715_v19 }
 0x3c2   :  { %1718 = vmatprep.subr.bf16.mxu0 %v1717_v25  ;;  %1721 = vmatprep.subr.bf16.mxu1 %v1717_v25 }
 0x3c4   :  { %1533 = vmatmul.mubr.msk.f32.vlgmr.msra.gmra.mrb[32].mxu0 %vm296_vm2, %v1952_v24  ;;  %1534 = vmatmul.mubr.msk.f32.vlgmr.msra.gmra.mrb[32].mxu1 %vm296_vm2, %v1952_v24 }
 0x3c5   :  { %1720 = vmatpush3.bf16.msra.mxu0 %v1717_v25  ;;  %1722 = vmatpush3.bf16.msra.mxu1 %v1717_v25 }
 0x497   :  { %v1031_v27 = vpop.f32.mrb[32].mxu0  ;;  %v1102_v28 = vpop.f32.mrb[32].mxu1 }
 0x498   :  { %v1032_v29 = vadd.f32 %v1031_v27, %v961_v26  ;;  %v1103_v30 = vadd.f32 %v1102_v28, %v961_v26  ;;  %v1033_v31 = vpop.f32.mrb[33].mxu0  ;;  %v1104_v24 = vpop.f32.mrb[33].mxu1 }
 0x499   :  { %v1034_v32 = vadd.f32 %v1033_v31, %v961_v26  ;;  %v1105_v33 = vadd.f32 %v1104_v24, %v961_v26 }
 0x49a   :  { %1138 = vrot.lane.b32.xlu1 %v1103_v30, %s1784_s21  ;;  %1108 = vrot.lane.b32.xlu0 %v1032_v29, %s1784_s21 }
 0x49b   :  { %1605 = vmatprep.mubr.msk.f32.mxu0 %vm1169_vm3, %v1032_v29  ;;  %1629 = vmatprep.mubr.msk.f32.mxu1 %vm1169_vm3, %v1103_v30 }
 0x49e   :  { %1140 = vrot.lane.b32.xlu1 %v1103_v30, %s1785_s4  ;;  %1110 = vrot.lane.b32.xlu0 %v1032_v29, %s1785_s4 }
 0x4a2   :  { %1142 = vrot.lane.b32.xlu1 %v1103_v30, %s1786_s22  ;;  %1112 = vrot.lane.b32.xlu0 %v1032_v29, %s1786_s22 }
 0x4a6   :  { %1144 = vrot.lane.b32.xlu1 %v1103_v30, %s1787_s23  ;;  %1114 = vrot.lane.b32.xlu0 %v1032_v29, %s1787_s23 }
 0x4aa   :  { %1146 = vrot.lane.b32.xlu1 %v1103_v30, %s1788_s24  ;;  %1116 = vrot.lane.b32.xlu0 %v1032_v29, %s1788_s24 }
 0x4ae   :  { %1148 = vrot.lane.b32.xlu1 %v1103_v30, %s1789_s25  ;;  %1118 = vrot.lane.b32.xlu0 %v1032_v29, %s1789_s25 }
 0x4b2   :  { %1150 = vrot.lane.b32.xlu1 %v1103_v30, %s1790_s26  ;;  %1120 = vrot.lane.b32.xlu0 %v1032_v29, %s1790_s26 }
 0x4b6   :  { %1153 = vrot.lane.b32.xlu1 %v1105_v33, %s1784_s21  ;;  %1123 = vrot.lane.b32.xlu0 %v1034_v32, %s1784_s21 }
 0x4ba   :  { %1155 = vrot.lane.b32.xlu1 %v1105_v33, %s1785_s4  ;;  %1125 = vrot.lane.b32.xlu0 %v1034_v32, %s1785_s4 }
 0x4be   :  { %1157 = vrot.lane.b32.xlu1 %v1105_v33, %s1786_s22  ;;  %1127 = vrot.lane.b32.xlu0 %v1034_v32, %s1786_s22 }
 0x4c2   :  { %1159 = vrot.lane.b32.xlu1 %v1105_v33, %s1787_s23  ;;  %1129 = vrot.lane.b32.xlu0 %v1034_v32, %s1787_s23 }
 0x4c6   :  { %1161 = vrot.lane.b32.xlu1 %v1105_v33, %s1788_s24  ;;  %1131 = vrot.lane.b32.xlu0 %v1034_v32, %s1788_s24 }
 0x4ca   :  { %1163 = vrot.lane.b32.xlu1 %v1105_v33, %s1789_s25  ;;  %1133 = vrot.lane.b32.xlu0 %v1034_v32, %s1789_s25 }
 0x4ce   :  { %1165 = vrot.lane.b32.xlu1 %v1105_v33, %s1790_s26  ;;  %1135 = vrot.lane.b32.xlu0 %v1034_v32, %s1790_s26 }
 0x50c   :  { %v1139_v34 = vpop.permute.xlu1 %1138  ;;  %v1109_v0 = vpop.permute.xlu0 %1108 }
 0x50d   :  { %1606 = vmatmul.mubr.msk.f32.vlgmr.msra.gmra.mrb[34].mxu0 %vm1169_vm3, %v1109_v0  ;;  %1630 = vmatmul.mubr.msk.f32.vlgmr.msra.gmra.mrb[34].mxu1 %vm1169_vm3, %v1139_v34 }
 0x510   :  { %v1141_v35 = vpop.permute.xlu1 %1140  ;;  %v1111_v4 = vpop.permute.xlu0 %1110 }
 0x511   :  { %1608 = vmatprep.mubr.msk.f32.mxu0 %vm1169_vm3, %v1111_v4  ;;  %1632 = vmatprep.mubr.msk.f32.mxu1 %vm1169_vm3, %v1141_v35 }
 0x514   :  { %v1143_v36 = vpop.permute.xlu1 %1142  ;;  %v1113_v8 = vpop.permute.xlu0 %1112 }
 0x515   :  { %1609 = vmatmul.mubr.msk.f32.gmra.mrb[36].mxu0 %vm1169_vm3, %v1113_v8  ;;  %1633 = vmatmul.mubr.msk.f32.gmra.mrb[36].mxu1 %vm1169_vm3, %v1143_v36 }
 0x518   :  { %v1145_v37 = vpop.permute.xlu1 %1144  ;;  %v1115_v7 = vpop.permute.xlu0 %1114 }
 0x519   :  { %1611 = vmatprep.mubr.msk.f32.mxu0 %vm1169_vm3, %v1115_v7  ;;  %1635 = vmatprep.mubr.msk.f32.mxu1 %vm1169_vm3, %v1145_v37 }
 0x51c   :  { %v1147_v38 = vpop.permute.xlu1 %1146  ;;  %v1117_v9 = vpop.permute.xlu0 %1116 }
 0x51d   :  { %1612 = vmatmul.mubr.msk.f32.gmra.mrb[38].mxu0 %vm1169_vm3, %v1117_v9  ;;  %1636 = vmatmul.mubr.msk.f32.gmra.mrb[38].mxu1 %vm1169_vm3, %v1147_v38 }
 0x520   :  { %v1149_v39 = vpop.permute.xlu1 %1148  ;;  %v1119_v40 = vpop.permute.xlu0 %1118 }
 0x521   :  { %1614 = vmatprep.mubr.msk.f32.mxu0 %vm1169_vm3, %v1119_v40  ;;  %1638 = vmatprep.mubr.msk.f32.mxu1 %vm1169_vm3, %v1149_v39 }
 0x524   :  { %v1151_v41 = vpop.permute.xlu1 %1150  ;;  %v1121_v42 = vpop.permute.xlu0 %1120 }
 0x525   :  { %1615 = vmatmul.mubr.msk.f32.gmra.mrb[40].mxu0 %vm1169_vm3, %v1121_v42  ;;  %1639 = vmatmul.mubr.msk.f32.gmra.mrb[40].mxu1 %vm1169_vm3, %v1151_v41 }
 0x526   :  { %1617 = vmatprep.mubr.msk.f32.mxu0 %vm1169_vm3, %v1034_v32  ;;  %1641 = vmatprep.mubr.msk.f32.mxu1 %vm1169_vm3, %v1105_v33 }
 0x528   :  { %v1154_v43 = vpop.permute.xlu1 %1153  ;;  %v1124_v44 = vpop.permute.xlu0 %1123 }
 0x529   :  { %1618 = vmatmul.mubr.msk.f32.gmra.mrb[42].mxu0 %vm1169_vm3, %v1124_v44  ;;  %1642 = vmatmul.mubr.msk.f32.gmra.mrb[42].mxu1 %vm1169_vm3, %v1154_v43 }
 0x52c   :  { %v1156_v45 = vpop.permute.xlu1 %1155  ;;  %v1126_v46 = vpop.permute.xlu0 %1125 }
 0x52d   :  { %1620 = vmatprep.mubr.msk.f32.mxu0 %vm1169_vm3, %v1126_v46  ;;  %1644 = vmatprep.mubr.msk.f32.mxu1 %vm1169_vm3, %v1156_v45 }
 0x530   :  { %v1158_v47 = vpop.permute.xlu1 %1157  ;;  %v1128_v48 = vpop.permute.xlu0 %1127 }
 0x531   :  { %1621 = vmatmul.mubr.msk.f32.gmra.mrb[44].mxu0 %vm1169_vm3, %v1128_v48  ;;  %1645 = vmatmul.mubr.msk.f32.gmra.mrb[44].mxu1 %vm1169_vm3, %v1158_v47 }
 0x534   :  { %v1160_v49 = vpop.permute.xlu1 %1159  ;;  %v1130_v50 = vpop.permute.xlu0 %1129 }
 0x535   :  { %1623 = vmatprep.mubr.msk.f32.mxu0 %vm1169_vm3, %v1130_v50  ;;  %1647 = vmatprep.mubr.msk.f32.mxu1 %vm1169_vm3, %v1160_v49 }
 0x538   :  { %v1162_v51 = vpop.permute.xlu1 %1161  ;;  %v1132_v52 = vpop.permute.xlu0 %1131 }
 0x539   :  { %1624 = vmatmul.mubr.msk.f32.gmra.mrb[46].mxu0 %vm1169_vm3, %v1132_v52  ;;  %1648 = vmatmul.mubr.msk.f32.gmra.mrb[46].mxu1 %vm1169_vm3, %v1162_v51 }
 0x53c   :  { %v1164_v53 = vpop.permute.xlu1 %1163  ;;  %v1134_v54 = vpop.permute.xlu0 %1133 }
 0x53d   :  { %1626 = vmatprep.mubr.msk.f32.mxu0 %vm1169_vm3, %v1134_v54  ;;  %1650 = vmatprep.mubr.msk.f32.mxu1 %vm1169_vm3, %v1164_v53 }
 0x540   :  { %v1166_v55 = vpop.permute.xlu1 %1165  ;;  %v1136_v56 = vpop.permute.xlu0 %1135 }
 0x541   :  { %1627 = vmatmul.mubr.msk.f32.gmra.mrb[48].mxu0 %vm1169_vm3, %v1136_v56  ;;  %1651 = vmatmul.mubr.msk.f32.gmra.mrb[48].mxu1 %vm1169_vm3, %v1166_v55 }
 0x5e0   :  { %v1607_v57 = vpop.f32.mrb[34].mxu0  ;;  %v1631_v58 = vpop.f32.mrb[34].mxu1 }
 0x5e1   :  { %1461 = vst.msk [vmem:[%s2130_s5 + $0x8] sm:$0xff] %vm1459_vm4, %v1607_v57  ;;  %1477 = vst.msk [vmem:[%s2130_s5 + $0x88] sm:$0xff] %vm1459_vm4, %v1631_v58  ;;  %v1300_v59 = vpop.f32.mrb[35].mxu0  ;;  %v1380_v60 = vpop.f32.mrb[35].mxu1 }
 0x5e2   :  { %1460 = vst.msk [vmem:[%s2130_s5] sm:$0xff] %vm1459_vm4, %v1300_v59  ;;  %1476 = vst.msk [vmem:[%s2130_s5 + $0x80] sm:$0xff] %vm1459_vm4, %v1380_v60 }
 0x5e8   :  { %v1610_v61 = vpop.f32.mrb[36].mxu0  ;;  %v1634_v62 = vpop.f32.mrb[36].mxu1 }
 0x5e9   :  { %1463 = vst.msk [vmem:[%s2130_s5 + $0x18] sm:$0xff] %vm1459_vm4, %v1610_v61  ;;  %1479 = vst.msk [vmem:[%s2130_s5 + $0x98] sm:$0xff] %vm1459_vm4, %v1634_v62  ;;  %v1310_v63 = vpop.f32.mrb[37].mxu0  ;;  %v1390_v1 = vpop.f32.mrb[37].mxu1 }
 0x5ea   :  { %1462 = vst.msk [vmem:[%s2130_s5 + $0x10] sm:$0xff] %vm1459_vm4, %v1310_v63  ;;  %1478 = vst.msk [vmem:[%s2130_s5 + $0x90] sm:$0xff] %vm1459_vm4, %v1390_v1 }
 0x5f0   :  { %v1613_v2 = vpop.f32.mrb[38].mxu0  ;;  %v1637_v3 = vpop.f32.mrb[38].mxu1 }
 0x5f1   :  { %1465 = vst.msk [vmem:[%s2130_s5 + $0x28] sm:$0xff] %vm1459_vm4, %v1613_v2  ;;  %1481 = vst.msk [vmem:[%s2130_s5 + $0xa8] sm:$0xff] %vm1459_vm4, %v1637_v3  ;;  %v1320_v5 = vpop.f32.mrb[39].mxu0  ;;  %v1400_v6 = vpop.f32.mrb[39].mxu1 }
 0x5f2   :  { %1464 = vst.msk [vmem:[%s2130_s5 + $0x20] sm:$0xff] %vm1459_vm4, %v1320_v5  ;;  %1480 = vst.msk [vmem:[%s2130_s5 + $0xa0] sm:$0xff] %vm1459_vm4, %v1400_v6 }
 0x5f8   :  { %v1616_v10 = vpop.f32.mrb[40].mxu0  ;;  %v1640_v11 = vpop.f32.mrb[40].mxu1 }
 0x5f9   :  { %1467 = vst.msk [vmem:[%s2130_s5 + $0x38] sm:$0xff] %vm1459_vm4, %v1616_v10  ;;  %1483 = vst.msk [vmem:[%s2130_s5 + $0xb8] sm:$0xff] %vm1459_vm4, %v1640_v11  ;;  %v1330_v12 = vpop.f32.mrb[41].mxu0  ;;  %v1410_v13 = vpop.f32.mrb[41].mxu1 }
 0x5fa   :  { %1466 = vst.msk [vmem:[%s2130_s5 + $0x30] sm:$0xff] %vm1459_vm4, %v1330_v12  ;;  %1482 = vst.msk [vmem:[%s2130_s5 + $0xb0] sm:$0xff] %vm1459_vm4, %v1410_v13 }
 0x5fc   :  { %v1619_v14 = vpop.f32.mrb[42].mxu0  ;;  %v1643_v15 = vpop.f32.mrb[42].mxu1 }
 0x5fd   :  { %1469 = vst.msk [vmem:[%s2130_s5 + $0x48] sm:$0xff] %vm1459_vm4, %v1619_v14  ;;  %1485 = vst.msk [vmem:[%s2130_s5 + $0xc8] sm:$0xff] %vm1459_vm4, %v1643_v15  ;;  %v1340_v16 = vpop.f32.mrb[43].mxu0  ;;  %v1420_v17 = vpop.f32.mrb[43].mxu1 }
 0x5fe   :  { %1468 = vst.msk [vmem:[%s2130_s5 + $0x40] sm:$0xff] %vm1459_vm4, %v1340_v16  ;;  %1484 = vst.msk [vmem:[%s2130_s5 + $0xc0] sm:$0xff] %vm1459_vm4, %v1420_v17 }
 0x604   :  { %v1622_v18 = vpop.f32.mrb[44].mxu0  ;;  %v1646_v19 = vpop.f32.mrb[44].mxu1 }
 0x605   :  { %1471 = vst.msk [vmem:[%s2130_s5 + $0x58] sm:$0xff] %vm1459_vm4, %v1622_v18  ;;  %1487 = vst.msk [vmem:[%s2130_s5 + $0xd8] sm:$0xff] %vm1459_vm4, %v1646_v19  ;;  %v1350_v20 = vpop.f32.mrb[45].mxu0  ;;  %v1430_v21 = vpop.f32.mrb[45].mxu1 }
 0x606   :  { %1470 = vst.msk [vmem:[%s2130_s5 + $0x50] sm:$0xff] %vm1459_vm4, %v1350_v20  ;;  %1486 = vst.msk [vmem:[%s2130_s5 + $0xd0] sm:$0xff] %vm1459_vm4, %v1430_v21 }
 0x60c   :  { %v1625_v22 = vpop.f32.mrb[46].mxu0  ;;  %v1649_v23 = vpop.f32.mrb[46].mxu1 }
 0x60d   :  { %1473 = vst.msk [vmem:[%s2130_s5 + $0x68] sm:$0xff] %vm1459_vm4, %v1625_v22  ;;  %1489 = vst.msk [vmem:[%s2130_s5 + $0xe8] sm:$0xff] %vm1459_vm4, %v1649_v23  ;;  %v1360_v25 = vpop.f32.mrb[47].mxu0  ;;  %v1440_v26 = vpop.f32.mrb[47].mxu1 }
 0x60e   :  { %1472 = vst.msk [vmem:[%s2130_s5 + $0x60] sm:$0xff] %vm1459_vm4, %v1360_v25  ;;  %1488 = vst.msk [vmem:[%s2130_s5 + $0xe0] sm:$0xff] %vm1459_vm4, %v1440_v26 }
 0x614   :  { %v1628_v27 = vpop.f32.mrb[48].mxu0  ;;  %v1652_v28 = vpop.f32.mrb[48].mxu1 }
 0x615   :  { %1475 = vst.msk [vmem:[%s2130_s5 + $0x78] sm:$0xff] %vm1459_vm4, %v1628_v27  ;;  %1491 = vst.msk [vmem:[%s2130_s5 + $0xf8] sm:$0xff] %vm1459_vm4, %v1652_v28  ;;  %v1370_v29 = vpop.f32.mrb[49].mxu0  ;;  %v1450_v30 = vpop.f32.mrb[49].mxu1 }
 0x616   :  { %1474 = vst.msk [vmem:[%s2130_s5 + $0x70] sm:$0xff] %vm1459_vm4, %v1370_v29  ;;  %1490 = vst.msk [vmem:[%s2130_s5 + $0xf0] sm:$0xff] %vm1459_vm4, %v1450_v30 }
 0x617   :  { %1496 = vsyncpa [#allocation3], 1 }

</bundles_post_ra>
